<compile_context>
chip_gen: v7x
topology: tpu7x:2x2x1
jax: 0.10.0
libtpu: 0.0.40
codegen_flags: <defaults>
</compile_context>

<pallas_src>
import functools

import jax
import jax.numpy as jnp
from jax.experimental import pallas as pl
from jax.experimental.pallas import tpu as pltpu


_IN = 784
_HID = 512


def _cdiv(a, b):
    return -(-a // b)


def _round_up(x, m):
    return ((x + m - 1) // m) * m


def _discriminator_kernel(x_ref, w1_ref, b1_ref, w23_ref, b23_ref, o_ref):
    # Load the f32 activation tile and cast to bf16 in-register (VPU work that
    # hides under the MXU); fc1 runs on the MXU with f32 accumulation.
    x_bf16 = x_ref[...].astype(jnp.bfloat16)                    # (TILE_B, 784)
    h1 = jnp.dot(x_bf16, w1_ref[...], preferred_element_type=jnp.float32)
    h1 = h1 + b1_ref[...]                                       # (TILE_B, 512) f32
    # LeakyReLU(0.2): single VPU max.
    h1 = jnp.maximum(h1, 0.2 * h1)

    # fc2 + fc3 fused into one 512 -> 1 projection: VPU multiply + XLU lane
    # reduce (keeps the N=1 projection off the MXU).
    h3 = jnp.sum(h1 * w23_ref[...], axis=-1, keepdims=True) + b23_ref[0]

    # Exact sigmoid: EUP exp + exact divide (EUP has huge slack here).
    o_ref[...] = 1.0 / (1.0 + jnp.exp(-h3))


def prepare_params(params):
    """One-time kernel-ready weight prep (hoisted out of the per-call path)."""
    w1 = params["w1"].astype(jnp.bfloat16)                         # (784, 512) bf16 (MXU)
    b1 = params["b1"].reshape(1, _HID).astype(jnp.float32)         # (1, 512)   f32
    # Fuse fc2/fc3 (no activation in between in the reference module): exact.
    w2 = params["w2"].astype(jnp.float32)
    w3 = params["w3"].astype(jnp.float32)
    w23 = (w2 @ w3).reshape(1, _HID).astype(jnp.float32)           # (1, 512)   f32
    b23 = (params["b2"].astype(jnp.float32) @ w3
           + params["b3"].astype(jnp.float32)).reshape(1)          # (1,)       f32
    return {"w1": w1, "b1": b1, "w23": w23, "b23": b23}


@functools.partial(jax.jit, static_argnames=("tile_b",))
def discriminator_forward(image, prep, tile_b=1024):
    """image: (..., 784 total per row) float32, e.g. (B, 1, 28, 28) NCHW.
    prep: output of prepare_params()."""
    x = image.reshape(-1, _IN)          # view(-1, 784); free reshape, no copy
    b = x.shape[0]

    # Adaptive batch tiling: no batch padding / no extra HBM pass over x.
    #  - at most ~tile_b rows per tile (pipeline overhead amortized),
    #  - >= 2 grid steps for b >= 256 (lets v7x's 2 TensorCores both work),
    #  - prefer an even number of steps for balanced two-core sharding,
    #  - ragged last block handled by Pallas (clipped DMA, masked writeback).
    num_tiles = max(1, _cdiv(b, tile_b))
    if num_tiles == 1 and b >= 256:
        num_tiles = 2
    elif num_tiles > 1 and num_tiles % 2 == 1:
        num_tiles += 1
    tb = _round_up(_cdiv(b, num_tiles), 8)
    grid = (_cdiv(b, tb),)

    out = pl.pallas_call(
        _discriminator_kernel,
        out_shape=jax.ShapeDtypeStruct((b, 1), jnp.float32),
        grid=grid,
        in_specs=[
            pl.BlockSpec((tb, _IN), lambda i: (i, 0)),             # x tiles stream (f32)
            pl.BlockSpec((_IN, _HID), lambda i: (0, 0)),           # w1 resident (bf16)
            pl.BlockSpec((1, _HID), lambda i: (0, 0)),             # b1 resident
            pl.BlockSpec((1, _HID), lambda i: (0, 0)),             # fused w23 resident
            pl.BlockSpec(memory_space=pltpu.MemorySpace.SMEM),     # fused bias scalar
        ],
        out_specs=pl.BlockSpec((tb, 1), lambda i: (i, 0)),
        compiler_params=pltpu.CompilerParams(
            dimension_semantics=("parallel",)),
    )(x, prep["w1"], prep["b1"], prep["w23"], prep["b23"])

    return out


def init_params(key):
    """Deterministic synthetic parameters matching nn.Linear shapes."""
    k1, k2, k3, k4, k5, k6 = jax.random.split(key, 6)

    def lin(kw, kb, fan_in, fan_out):
        bound = 1.0 / jnp.sqrt(fan_in)
        w = jax.random.uniform(kw, (fan_in, fan_out), jnp.float32, -bound, bound)
        bias = jax.random.uniform(kb, (1, fan_out), jnp.float32, -bound, bound)
        return w, bias

    w1, b1 = lin(k1, k2, 784, 512)
    w2, b2 = lin(k3, k4, 512, 128)
    w3, b3 = lin(k5, k6, 128, 1)
    return {"w1": w1, "b1": b1, "w2": w2, "b2": b2, "w3": w3, "b3": b3}


if __name__ == "__main__":
    key = jax.random.PRNGKey(0)
    k_img, k_par = jax.random.split(key)

    batch = 2
    image = jax.random.normal(k_img, (batch, 1, 28, 28), jnp.float32)  # NCHW
    params = init_params(k_par)
    prep = prepare_params(params)  # one-time weight prep, reused across calls

    out = discriminator_forward(image, prep)
    out = jax.block_until_ready(out)

    # Pure-JAX f32 reference of the original module's math.
    x = image.reshape(batch, 784)
    h1 = x @ params["w1"] + params["b1"]
    h1 = jnp.where(h1 > 0, h1, 0.2 * h1)
    h2 = h1 @ params["w2"] + params["b2"]
    h3 = h2 @ params["w3"] + params["b3"]
    ref = jax.nn.sigmoid(h3)

    assert out.shape == (batch, 1)
    # bf16 fc1 inputs/weights shift results slightly vs the f32 reference.
    assert jnp.allclose(out, ref, atol=1e-2, rtol=1e-2), (out, ref)

    print("KERNEL_OK")
</pallas_src>

<mosaic_0001>
module attributes {stable_mosaic.version = 11 : i64} {
  func.func @_discriminator_kernel(%arg0: i32, %arg1: memref<8x784xf32, #tpu.memory_space<vmem>>, %arg2: memref<784x512xbf16, #tpu.memory_space<vmem>>, %arg3: memref<1x512xf32, #tpu.memory_space<vmem>>, %arg4: memref<1x512xf32, #tpu.memory_space<vmem>>, %arg5: memref<1xf32, #tpu.memory_space<smem>>, %arg6: memref<8x1xf32, #tpu.memory_space<vmem>>) attributes {dimension_semantics = [#tpu.dimension_semantics<parallel>], iteration_bounds = array<i64: 1>, scalar_prefetch = 0 : i64, scratch_operands = 0 : i64, tpu.core_type = #tpu.core_type<tc>, window_params = [{transform_indices = @transform_0, window_bounds = array<i64: 8, 784>}, {pipeline_mode = #tpu.pipeline_mode<synchronous>, transform_indices = @transform_1, window_bounds = array<i64: 784, 512>}, {pipeline_mode = #tpu.pipeline_mode<synchronous>, transform_indices = @transform_2, window_bounds = array<i64: 1, 512>}, {pipeline_mode = #tpu.pipeline_mode<synchronous>, transform_indices = @transform_3, window_bounds = array<i64: 1, 512>}, {transform_indices = @transform_4, window_bounds = array<i64: 1>}, {transform_indices = @transform_5, window_bounds = array<i64: 8, 1>}]} {
    %c0 = arith.constant 0 : index
    %c0_0 = arith.constant 0 : index
    %0 = vector.load %arg1[%c0, %c0_0] : memref<8x784xf32, #tpu.memory_space<vmem>>, vector<8x784xf32>
    %1 = arith.truncf %0 : vector<8x784xf32> to vector<8x784xbf16>
    %c0_1 = arith.constant 0 : index
    %c0_2 = arith.constant 0 : index
    %2 = vector.load %arg2[%c0_1, %c0_2] : memref<784x512xbf16, #tpu.memory_space<vmem>>, vector<784x512xbf16>
    %cst = arith.constant dense<0.000000e+00> : vector<8x512xf32>
    %3 = tpu.matmul %1, %2, %cst {dimension_numbers = #tpu.dot_dimension_numbers<[1], [0], [0], [1], [0, 0, 1, 1], [], []>} : vector<8x784xbf16>, vector<784x512xbf16>, vector<8x512xf32> -> vector<8x512xf32>
    %c0_3 = arith.constant 0 : index
    %c0_4 = arith.constant 0 : index
    %4 = vector.load %arg3[%c0_3, %c0_4] : memref<1x512xf32, #tpu.memory_space<vmem>>, vector<1x512xf32>
    %5 = vector.broadcast %4 : vector<1x512xf32> to vector<8x512xf32>
    %6 = arith.addf %3, %5 : vector<8x512xf32>
    %cst_5 = arith.constant 2.000000e-01 : f32
    %7 = vector.broadcast %cst_5 : f32 to vector<8x512xf32>
    %8 = arith.mulf %7, %6 : vector<8x512xf32>
    %9 = arith.maximumf %6, %8 : vector<8x512xf32>
    %c0_6 = arith.constant 0 : index
    %c0_7 = arith.constant 0 : index
    %10 = vector.load %arg4[%c0_6, %c0_7] : memref<1x512xf32, #tpu.memory_space<vmem>>, vector<1x512xf32>
    %11 = vector.broadcast %10 : vector<1x512xf32> to vector<8x512xf32>
    %12 = arith.mulf %9, %11 : vector<8x512xf32>
    %cst_8 = arith.constant dense<0.000000e+00> : vector<8xf32>
    %13 = vector.multi_reduction <add>, %12, %cst_8 [1] : vector<8x512xf32> to vector<8xf32>
    %14 = vector.shape_cast %13 : vector<8xf32> to vector<8x1xf32>
    %c0_9 = arith.constant 0 : index
    %15 = memref.load %arg5[%c0_9] : memref<1xf32, #tpu.memory_space<smem>>
    %16 = vector.broadcast %15 : f32 to vector<8x1xf32>
    %17 = arith.addf %14, %16 : vector<8x1xf32>
    %cst_10 = arith.constant 0.000000e+00 : f32
    %18 = vector.broadcast %cst_10 : f32 to vector<8x1xf32>
    %19 = arith.subf %18, %17 : vector<8x1xf32>
    %20 = math.exp %19 : vector<8x1xf32>
    %cst_11 = arith.constant 1.000000e+00 : f32
    %21 = vector.broadcast %cst_11 : f32 to vector<8x1xf32>
    %22 = arith.addf %21, %20 : vector<8x1xf32>
    %cst_12 = arith.constant 1.000000e+00 : f32
    %23 = vector.broadcast %cst_12 : f32 to vector<8x1xf32>
    %24 = arith.divf %23, %22 : vector<8x1xf32>
    %c0_13 = arith.constant 0 : index
    %c0_14 = arith.constant 0 : index
    %25 = vector.load %arg6[%c0_13, %c0_14] : memref<8x1xf32, #tpu.memory_space<vmem>>, vector<8x1xf32>
    tpu.vector_store %arg6[%c0_13, %c0_14], %24 {strides = array<i32>} : memref<8x1xf32, #tpu.memory_space<vmem>>, vector<8x1xf32>,
    return
  }
  func.func @transform_0(%arg0: i32) -> (i32, i32) {
    %c0_i32 = arith.constant 0 : i32
    %c0_i32_0 = arith.constant 0 : i32
    return %arg0, %c0_i32 : i32, i32
  }
  func.func @transform_1(%arg0: i32) -> (i32, i32) {
    %c0_i32 = arith.constant 0 : i32
    %c0_i32_0 = arith.constant 0 : i32
    %c0_i32_1 = arith.constant 0 : i32
    return %c0_i32, %c0_i32_0 : i32, i32
  }
  func.func @transform_2(%arg0: i32) -> (i32, i32) {
    %c0_i32 = arith.constant 0 : i32
    %c0_i32_0 = arith.constant 0 : i32
    %c0_i32_1 = arith.constant 0 : i32
    return %c0_i32, %c0_i32_0 : i32, i32
  }
  func.func @transform_3(%arg0: i32) -> (i32, i32) {
    %c0_i32 = arith.constant 0 : i32
    %c0_i32_0 = arith.constant 0 : i32
    %c0_i32_1 = arith.constant 0 : i32
    return %c0_i32, %c0_i32_0 : i32, i32
  }
  func.func @transform_4(%arg0: i32) -> i32 {
    %c0_i32 = arith.constant 0 : i32
    %c0_i32_0 = arith.constant 0 : i32
    return %c0_i32 : i32
  }
  func.func @transform_5(%arg0: i32) -> (i32, i32) {
    %c0_i32 = arith.constant 0 : i32
    %c0_i32_0 = arith.constant 0 : i32
    return %arg0, %c0_i32 : i32, i32
  }
}

</mosaic_0001>

<bundles_post_ra>
// kernel: discriminator_forward.1
= control target key start
LH: loop header
LB: loop body
LE: loop exit
PB: predicated region body
PF: predicated region fallthrough
CT: control target
= control target key end

     0   :  { %11 = vsyncpa [#allocation4], 0  ;;  %s2322_s18 = smov [#allocation3]   ;;  %s2438_s0 = inlined_call_operand.vmem [shape: f32[2,784], index: 0, kind: input, shape index: {}]   ;;  %s2439_s1 = inlined_call_operand.hbm [shape: bf16[784,512], index: 1, kind: input, shape index: {}]   ;;  %s2440_s2 = inlined_call_operand.vmem [shape: f32[1,512], index: 2, kind: input, shape index: {}]   ;;  %s2441_s3 = inlined_call_operand.vmem [shape: f32[1,512], index: 3, kind: input, shape index: {}]   ;;  %s2442_s4 = inlined_call_operand.<no memory space> [shape: f32[1], index: 4, kind: input, shape index: {}]   ;;  %s2443_s5 = inlined_call_operand.vmem [shape: f32[2,1], index: 5, kind: output, shape index: {}]  }
   0x1   :  { %s19_s19 = sshll.u32 %s2322_s18, 4  ;;  %s2298_s22 = scalar_lea.hbm %s2439_s1, 25088  ;;  %s20_s19 = int_to_ptr.vmem [resolvable:$true] %s19_s19 }
   0x2   :  { %p2299_p0 = scmp.ne.s32.totalorder %s2439_s1, %s2298_s22  ;;  %p2302_p1 = scmp.lt.u32.totalorder %s2298_s22, %s2439_s1 }
   0x4   :  { %p2304_p2 = pnand %p2302_p1, %p2299_p0 }
   0x6   :  { %2307 = shalt.err (!%p2304_p2)
}
   0x7   :  { %s2308_s27 = scalar_lea.vmem %s20_s19, 25088  ;;  %p2313_p4 = scmp.lt.s32.totalorder %s20_s19, %s20_s19 }
   0x8   :  { %p2309_p3 = scmp.ne.s32.totalorder %s20_s19, %s2308_s27  ;;  %p2314_p5 = scmp.lt.s32.totalorder %s2308_s27, %s2308_s27 }
   0xa   :  { %p2315_p6 = por %p2314_p5, %p2313_p4 }
   0xc   :  { %p2316_p7 = pnand %p2315_p6, %p2309_p3 }
   0xe   :  { %2319 = shalt.err (!%p2316_p7)
}
   0xf   :  { %s2323_s28 = smov 256   ;;  %s2324_s29 = smov 16  }
  0x10   :  { %25 = dma.hbm_to_vmem [thread:$0]  %s2439_s1, 25088, %s20_s19, [#allocation4], %s2323_s28, %s2323_s28, %s2324_s29  }
  0x11   :  { %2320 = dma.done.wait [#allocation4], 25088  }
  0x12   :  { %2321 = vsyncadd [#allocation4], 4294942208  ;;  %v1988_v0 = vld [vmem:[#allocation3 + $0x4] ss:$16 sps:$4 sm:$0xff]   ;;  %v1990_v1 = vld [vmem:[#allocation3 + $0xc] ss:$16 sps:$4 sm:$0xff]   ;;  %v59_v40 = vlaneseq }
  0x13   :  { %1339 = vmatprep.subr.bf16.mxu0 %v1988_v0  ;;  %v1992_v2 = vld [vmem:[#allocation3] ss:$16 sps:$4 sm:$0xff]   ;;  %v1993_v3 = vld [vmem:[#allocation3 + $0x8] ss:$16 sps:$4 sm:$0xff]   ;;  %1503 = vmatprep.subr.bf16.mxu1 %v1990_v1  ;;  %v1994_v4 = vld [vmem:[#allocation3 + $0x24] ss:$16 sps:$4 sm:$0xff]  }
  0x14   :  { %1340 = vmatpush1.bf16.msra.mxu0 %v1992_v2  ;;  %1504 = vmatpush1.bf16.msra.mxu1 %v1993_v3  ;;  %v1996_v5 = vld [vmem:[#allocation3 + $0x2c] ss:$16 sps:$4 sm:$0xff]   ;;  %v1998_v6 = vld [vmem:[#allocation3 + $0x20] ss:$16 sps:$4 sm:$0xff]   ;;  %v1999_v7 = vld [vmem:[#allocation3 + $0x28] ss:$16 sps:$4 sm:$0xff]  }
  0x15   :  { %1341 = vmatprep.subr.bf16.mxu0 %v1994_v4  ;;  %1505 = vmatprep.subr.bf16.mxu1 %v1996_v5  ;;  %v2000_v8 = vld [vmem:[#allocation3 + $0x44] ss:$16 sps:$4 sm:$0xff]   ;;  %v2002_v9 = vld [vmem:[#allocation3 + $0x4c] ss:$16 sps:$4 sm:$0xff]   ;;  %v2004_v10 = vld [vmem:[#allocation3 + $0x40] ss:$16 sps:$4 sm:$0xff]  }
  0x16   :  { %v2005_v11 = vld [vmem:[#allocation3 + $0x48] ss:$16 sps:$4 sm:$0xff]   ;;  %v2006_v12 = vld [vmem:[#allocation3 + $0x64] ss:$16 sps:$4 sm:$0xff]   ;;  %v2008_v13 = vld [vmem:[#allocation3 + $0x6c] ss:$16 sps:$4 sm:$0xff]  }
  0x17   :  { %v2010_v14 = vld [vmem:[#allocation3 + $0x60] ss:$16 sps:$4 sm:$0xff]   ;;  %v2011_v15 = vld [vmem:[#allocation3 + $0x68] ss:$16 sps:$4 sm:$0xff]   ;;  %v2012_v16 = vld [vmem:[#allocation3 + $0x84] ss:$16 sps:$4 sm:$0xff]  }
  0x18   :  { %1342 = vmatpush1.bf16.msra.mxu0 %v1998_v6  ;;  %1506 = vmatpush1.bf16.msra.mxu1 %v1999_v7  ;;  %v2014_v17 = vld [vmem:[#allocation3 + $0x8c] ss:$16 sps:$4 sm:$0xff]   ;;  %v2016_v18 = vld [vmem:[#allocation3 + $0x80] ss:$16 sps:$4 sm:$0xff]   ;;  %v2017_v19 = vld [vmem:[#allocation3 + $0x88] ss:$16 sps:$4 sm:$0xff]  }
  0x19   :  { %1343 = vmatprep.subr.bf16.mxu0 %v2000_v8  ;;  %1507 = vmatprep.subr.bf16.mxu1 %v2002_v9  ;;  %v2018_v20 = vld [vmem:[#allocation3 + $0xa4] ss:$16 sps:$4 sm:$0xff]   ;;  %v2020_v21 = vld [vmem:[#allocation3 + $0xac] ss:$16 sps:$4 sm:$0xff]   ;;  %v2022_v22 = vld [vmem:[#allocation3 + $0xa0] ss:$16 sps:$4 sm:$0xff]  }
  0x1a   :  { %v2023_v23 = vld [vmem:[#allocation3 + $0xa8] ss:$16 sps:$4 sm:$0xff]   ;;  %v2024_v24 = vld [vmem:[#allocation3 + $0xc4] ss:$16 sps:$4 sm:$0xff]   ;;  %v2026_v25 = vld [vmem:[#allocation3 + $0xcc] ss:$16 sps:$4 sm:$0xff]  }
  0x1b   :  { %v2028_v26 = vld [vmem:[#allocation3 + $0xc0] ss:$16 sps:$4 sm:$0xff]   ;;  %v2029_v27 = vld [vmem:[#allocation3 + $0xc8] ss:$16 sps:$4 sm:$0xff]   ;;  %v2030_v28 = vld [vmem:[#allocation3 + $0xe4] ss:$16 sps:$4 sm:$0xff]  }
  0x1c   :  { %1344 = vmatpush1.bf16.msra.mxu0 %v2004_v10  ;;  %1508 = vmatpush1.bf16.msra.mxu1 %v2005_v11  ;;  %v2032_v29 = vld [vmem:[#allocation3 + $0xec] ss:$16 sps:$4 sm:$0xff]   ;;  %v2034_v30 = vld [vmem:[#allocation3 + $0xe0] ss:$16 sps:$4 sm:$0xff]   ;;  %v2035_v31 = vld [vmem:[#allocation3 + $0xe8] ss:$16 sps:$4 sm:$0xff]  }
  0x1d   :  { %1345 = vmatprep.subr.bf16.mxu0 %v2006_v12  ;;  %1509 = vmatprep.subr.bf16.mxu1 %v2008_v13  ;;  %v2036_v32 = vld [vmem:[#allocation3 + $0x104] ss:$16 sps:$4 sm:$0xff]   ;;  %v2038_v33 = vld [vmem:[#allocation3 + $0x10c] ss:$16 sps:$4 sm:$0xff]   ;;  %v2040_v34 = vld [vmem:[#allocation3 + $0x100] ss:$16 sps:$4 sm:$0xff]  }
  0x1e   :  { %v2041_v35 = vld [vmem:[#allocation3 + $0x108] ss:$16 sps:$4 sm:$0xff]   ;;  %v2042_v36 = vld [vmem:[#allocation3 + $0x124] ss:$16 sps:$4 sm:$0xff]   ;;  %v2044_v37 = vld [vmem:[#allocation3 + $0x12c] ss:$16 sps:$4 sm:$0xff]  }
  0x1f   :  { %v2325_v38 = vmov 1983009808   ;;  %v2046_v41 = vld [vmem:[#allocation3 + $0x120] ss:$16 sps:$4 sm:$0xff]   ;;  %v2047_v42 = vld [vmem:[#allocation3 + $0x128] ss:$16 sps:$4 sm:$0xff]  }
  0x20   :  { %1346 = vmatpush1.bf16.msra.mxu0 %v2010_v14  ;;  %1510 = vmatpush1.bf16.msra.mxu1 %v2011_v15  ;;  %v57_v39 = vunpack.c.l.s4 %v2325_v38  ;;  %v2048_v43 = vld [vmem:[#allocation3 + $0x144] ss:$16 sps:$4 sm:$0xff]   ;;  %v2050_v44 = vld [vmem:[#allocation3 + $0x14c] ss:$16 sps:$4 sm:$0xff]   ;;  %v2369_v46 = vshrl.u32 %v59_v40, 7  ;;  %vm1335_vm0 = vcmask 130048  }
  0x21   :  { %1347 = vmatprep.subr.bf16.mxu0 %v2012_v16  ;;  %1511 = vmatprep.subr.bf16.mxu1 %v2014_v17  ;;  %v2052_v47 = vld [vmem:[#allocation3 + $0x140] ss:$16 sps:$4 sm:$0xff]   ;;  %v2053_v48 = vld [vmem:[#allocation3 + $0x148] ss:$16 sps:$4 sm:$0xff]   ;;  %v2054_v49 = vld [vmem:[#allocation3 + $0x164] ss:$16 sps:$4 sm:$0xff]  }
  0x22   :  { %v58_v45 = vunpack.c.0.s8 %v57_v39  ;;  %v2056_v50 = vld [vmem:[#allocation3 + $0x16c] ss:$16 sps:$4 sm:$0xff]   ;;  %v2058_v51 = vld [vmem:[#allocation3 + $0x160] ss:$16 sps:$4 sm:$0xff]   ;;  %v2059_v52 = vld [vmem:[#allocation3 + $0x168] ss:$16 sps:$4 sm:$0xff]  }
  0x23   :  { %v2060_v54 = vld [vmem:[#allocation3 + $0x184] ss:$16 sps:$4 sm:$0xff]   ;;  %v2084_v55 = vld [vmem:[%s2438_s0] ss:$14 sps:$4 sm:$0xff]   ;;  %v2087_v56 = vld [vmem:[%s2438_s0 + $0x1c] ss:$14 sps:$4 sm:$0xff]  }
  0x24   :  { %1348 = vmatpush1.bf16.msra.mxu0 %v2016_v18  ;;  %1512 = vmatpush1.bf16.msra.mxu1 %v2017_v19  ;;  %v2372_v53 = vsub.s32 %v58_v45, %v2369_v46  ;;  %v2062_v57 = vld [vmem:[#allocation3 + $0x18c] ss:$16 sps:$4 sm:$0xff]   ;;  %v2064_v60 = vld [vmem:[#allocation3 + $0x180] ss:$16 sps:$4 sm:$0xff]   ;;  %v2065_v61 = vld [vmem:[#allocation3 + $0x188] ss:$16 sps:$4 sm:$0xff]  }
  0x25   :  { %1349 = vmatprep.subr.bf16.mxu0 %v2018_v20  ;;  %1513 = vmatprep.subr.bf16.mxu1 %v2020_v21  ;;  %v2066_v62 = vld [vmem:[#allocation3 + $0x1a4] ss:$16 sps:$4 sm:$0xff]   ;;  %v2068_v0 = vld [vmem:[#allocation3 + $0x1ac] ss:$16 sps:$4 sm:$0xff]   ;;  %v2070_v2 = vld [vmem:[#allocation3 + $0x1a0] ss:$16 sps:$4 sm:$0xff]  }
  0x26   :  { %v62_v58 = vrot.slane %v2084_v55, %v2372_v53  ;;  %v76_v59 = vrot.slane %v2087_v56, %v2372_v53  ;;  %v2071_v3 = vld [vmem:[#allocation3 + $0x1a8] ss:$16 sps:$4 sm:$0xff]   ;;  %v2072_v4 = vld [vmem:[#allocation3 + $0x1c4] ss:$16 sps:$4 sm:$0xff]   ;;  %v2074_v5 = vld [vmem:[#allocation3 + $0x1cc] ss:$16 sps:$4 sm:$0xff]  }
  0x27   :  { %v2086_v6 = vld [vmem:[%s2438_s0 + $0x4] ss:$14 sps:$4 sm:$0xff]   ;;  %v2089_v7 = vld [vmem:[%s2438_s0 + $0x20] ss:$14 sps:$4 sm:$0xff]   ;;  %v2077_v9 = vld [vmem:[#allocation3 + $0x1c8] ss:$16 sps:$4 sm:$0xff]  }
  0x28   :  { %1350 = vmatpush1.bf16.msra.mxu0 %v2022_v22  ;;  %1514 = vmatpush1.bf16.msra.mxu1 %v2023_v23  ;;  %v85_v63 = vcombine.high %v62_v58, %v76_v59  ;;  %v2076_v8 = vld [vmem:[#allocation3 + $0x1c0] ss:$16 sps:$4 sm:$0xff]   ;;  %v2078_v10 = vld [vmem:[#allocation3 + $0x1e4] ss:$16 sps:$4 sm:$0xff]   ;;  %v2080_v11 = vld [vmem:[#allocation3 + $0x1ec] ss:$16 sps:$4 sm:$0xff]   ;;  %v2389_v12 = vrot.slane %v2086_v6, %v2372_v53  ;;  %v2392_v13 = vrot.slane %v2089_v7, %v2372_v53 }
  0x29   :  { %1351 = vmatprep.subr.bf16.mxu0 %v2024_v24  ;;  %1515 = vmatprep.subr.bf16.mxu1 %v2026_v25  ;;  %v2082_v14 = vld [vmem:[#allocation3 + $0x1e0] ss:$16 sps:$4 sm:$0xff]   ;;  %v2083_v15 = vld [vmem:[#allocation3 + $0x1e8] ss:$16 sps:$4 sm:$0xff]   ;;  %v84_v16 = vcombine.low %v62_v58, %v76_v59  ;;  %v2092_v17 = vld [vmem:[#allocation3 + $0x204] ss:$16 sps:$4 sm:$0xff]  }
  0x2a   :  { %v131_v1 = vpack.c.bf16 %v85_v63, %v85_v63  ;;  %v2095_v18 = vld [vmem:[#allocation3 + $0x20c] ss:$16 sps:$4 sm:$0xff]   ;;  %v87_v19 = vcombine.high %v2389_v12, %v2392_v13  ;;  %v2090_v20 = vld [vmem:[#allocation3 + $0x200] ss:$16 sps:$4 sm:$0xff]   ;;  %v2093_v21 = vld [vmem:[#allocation3 + $0x208] ss:$16 sps:$4 sm:$0xff]  }
  0x2b   :  { %v130_v22 = vpack.c.bf16 %v84_v16, %v84_v16  ;;  %v2098_v23 = vld [vmem:[#allocation3 + $0x224] ss:$16 sps:$4 sm:$0xff]   ;;  %v2101_v24 = vld [vmem:[#allocation3 + $0x22c] ss:$16 sps:$4 sm:$0xff]   ;;  %v2114_v38 = vld [vmem:[#allocation3 + $0x280] ss:$16 sps:$4 sm:$0xff]  }
  0x2c   :  { %1352 = vmatpush1.bf16.msra.mxu0 %v2028_v26  ;;  %1516 = vmatpush1.bf16.msra.mxu1 %v2029_v27  ;;  %v133_v25 = vpack.c.bf16 %v87_v19, %v87_v19  ;;  %v2096_v26 = vld [vmem:[#allocation3 + $0x220] ss:$16 sps:$4 sm:$0xff]   ;;  %v2099_v27 = vld [vmem:[#allocation3 + $0x228] ss:$16 sps:$4 sm:$0xff]   ;;  %v2122_v40 = vld [vmem:[#allocation3 + $0x2a4] ss:$16 sps:$4 sm:$0xff]  }
  0x2d   :  { %1353 = vmatprep.subr.bf16.mxu0 %v2030_v28  ;;  %1517 = vmatprep.subr.bf16.mxu1 %v2032_v29  ;;  %v2104_v28 = vld [vmem:[#allocation3 + $0x244] ss:$16 sps:$4 sm:$0xff]   ;;  %v2107_v29 = vld [vmem:[#allocation3 + $0x24c] ss:$16 sps:$4 sm:$0xff]   ;;  %v2117_v39 = vld [vmem:[#allocation3 + $0x288] ss:$16 sps:$4 sm:$0xff]  }
  0x2e   :  { %1371 = vmatprep.mubr.bf16.mxu0 %v131_v1  ;;  %1535 = vmatprep.mubr.bf16.mxu1 %v131_v1  ;;  %v2131_v45 = vld [vmem:[#allocation3 + $0x2cc] ss:$16 sps:$4 sm:$0xff]   ;;  %v2138_v56 = vld [vmem:[#allocation3 + $0x300] ss:$16 sps:$4 sm:$0xff]   ;;  %v2146_v58 = vld [vmem:[#allocation3 + $0x324] ss:$16 sps:$4 sm:$0xff]  }
  0x2f   :  { %v2143_v55 = vld [vmem:[#allocation3 + $0x30c] ss:$16 sps:$4 sm:$0xff]   ;;  %v2153_v1 = vld [vmem:[#allocation3 + $0x348] ss:$16 sps:$4 sm:$0xff]   ;;  %v2164_v6 = vld [vmem:[#allocation3 + $0x384] ss:$16 sps:$4 sm:$0xff]  }
  0x30   :  { %1354 = vmatpush1.bf16.msra.mxu0 %v2034_v30  ;;  %1518 = vmatpush1.bf16.msra.mxu1 %v2035_v31  ;;  %v2102_v30 = vld [vmem:[#allocation3 + $0x240] ss:$16 sps:$4 sm:$0xff]   ;;  %v2105_v31 = vld [vmem:[#allocation3 + $0x248] ss:$16 sps:$4 sm:$0xff]   ;;  %v2149_v59 = vld [vmem:[#allocation3 + $0x32c] ss:$16 sps:$4 sm:$0xff]  }
  0x31   :  { %1355 = vmatprep.subr.bf16.mxu0 %v2036_v32  ;;  %1519 = vmatprep.subr.bf16.mxu1 %v2038_v33  ;;  %v2110_v32 = vld [vmem:[#allocation3 + $0x264] ss:$16 sps:$4 sm:$0xff]   ;;  %v2113_v33 = vld [vmem:[#allocation3 + $0x26c] ss:$16 sps:$4 sm:$0xff]   ;;  %v2177_v19 = vld [vmem:[#allocation3 + $0x3c8] ss:$16 sps:$4 sm:$0xff]  }
  0x32   :  { %v2155_v63 = vld [vmem:[#allocation3 + $0x34c] ss:$16 sps:$4 sm:$0xff]   ;;  %v2176_v16 = vld [vmem:[#allocation3 + $0x3c4] ss:$16 sps:$4 sm:$0xff]   ;;  %vm1715_vm1 = vcmask 7168  }
  0x33   :  { %v2167_v7 = vld [vmem:[#allocation3 + $0x38c] ss:$16 sps:$4 sm:$0xff]  }
  0x34   :  { %1356 = vmatpush1.bf16.msra.mxu0 %v2040_v34  ;;  %1520 = vmatpush1.bf16.msra.mxu1 %v2041_v35  ;;  %v2108_v34 = vld [vmem:[#allocation3 + $0x260] ss:$16 sps:$4 sm:$0xff]   ;;  %v2111_v35 = vld [vmem:[#allocation3 + $0x268] ss:$16 sps:$4 sm:$0xff]  }
  0x35   :  { %1357 = vmatprep.subr.bf16.mxu0 %v2042_v36  ;;  %1521 = vmatprep.subr.bf16.mxu1 %v2044_v37  ;;  %v2116_v36 = vld [vmem:[#allocation3 + $0x284] ss:$16 sps:$4 sm:$0xff]   ;;  %v2119_v37 = vld [vmem:[#allocation3 + $0x28c] ss:$16 sps:$4 sm:$0xff]  }
  0x38   :  { %1358 = vmatpush1.bf16.msra.mxu0 %v2046_v41  ;;  %1522 = vmatpush1.bf16.msra.mxu1 %v2047_v42  ;;  %v2125_v41 = vld [vmem:[#allocation3 + $0x2ac] ss:$16 sps:$4 sm:$0xff]   ;;  %v2120_v42 = vld [vmem:[#allocation3 + $0x2a0] ss:$16 sps:$4 sm:$0xff]  }
  0x39   :  { %1359 = vmatprep.subr.bf16.mxu0 %v2048_v43  ;;  %1523 = vmatprep.subr.bf16.mxu1 %v2050_v44  ;;  %v2123_v43 = vld [vmem:[#allocation3 + $0x2a8] ss:$16 sps:$4 sm:$0xff]   ;;  %v2128_v44 = vld [vmem:[#allocation3 + $0x2c4] ss:$16 sps:$4 sm:$0xff]  }
  0x3c   :  { %1360 = vmatpush1.bf16.msra.mxu0 %v2052_v47  ;;  %1524 = vmatpush1.bf16.msra.mxu1 %v2053_v48  ;;  %v2126_v47 = vld [vmem:[#allocation3 + $0x2c0] ss:$16 sps:$4 sm:$0xff]   ;;  %v2129_v48 = vld [vmem:[#allocation3 + $0x2c8] ss:$16 sps:$4 sm:$0xff]  }
  0x3d   :  { %1361 = vmatprep.subr.bf16.mxu0 %v2054_v49  ;;  %1525 = vmatprep.subr.bf16.mxu1 %v2056_v50  ;;  %v2134_v49 = vld [vmem:[#allocation3 + $0x2e4] ss:$16 sps:$4 sm:$0xff]   ;;  %v2137_v50 = vld [vmem:[#allocation3 + $0x2ec] ss:$16 sps:$4 sm:$0xff]  }
  0x40   :  { %1362 = vmatpush1.bf16.msra.mxu0 %v2058_v51  ;;  %1526 = vmatpush1.bf16.msra.mxu1 %v2059_v52  ;;  %v2132_v51 = vld [vmem:[#allocation3 + $0x2e0] ss:$16 sps:$4 sm:$0xff]   ;;  %v2135_v52 = vld [vmem:[#allocation3 + $0x2e8] ss:$16 sps:$4 sm:$0xff]  }
  0x41   :  { %1363 = vmatprep.subr.bf16.mxu0 %v2060_v54  ;;  %1527 = vmatprep.subr.bf16.mxu1 %v2062_v57  ;;  %v2140_v54 = vld [vmem:[#allocation3 + $0x304] ss:$16 sps:$4 sm:$0xff]   ;;  %v2141_v57 = vld [vmem:[#allocation3 + $0x308] ss:$16 sps:$4 sm:$0xff]  }
  0x44   :  { %1364 = vmatpush1.bf16.msra.mxu0 %v2064_v60  ;;  %1528 = vmatpush1.bf16.msra.mxu1 %v2065_v61  ;;  %v2144_v60 = vld [vmem:[#allocation3 + $0x320] ss:$16 sps:$4 sm:$0xff]   ;;  %v2147_v61 = vld [vmem:[#allocation3 + $0x328] ss:$16 sps:$4 sm:$0xff]  }
  0x45   :  { %1365 = vmatprep.subr.bf16.mxu0 %v2066_v62  ;;  %1529 = vmatprep.subr.bf16.mxu1 %v2068_v0  ;;  %v2152_v62 = vld [vmem:[#allocation3 + $0x344] ss:$16 sps:$4 sm:$0xff]   ;;  %v2150_v0 = vld [vmem:[#allocation3 + $0x340] ss:$16 sps:$4 sm:$0xff]  }
  0x48   :  { %1366 = vmatpush1.bf16.msra.mxu0 %v2070_v2  ;;  %1530 = vmatpush1.bf16.msra.mxu1 %v2071_v3  ;;  %v2158_v2 = vld [vmem:[#allocation3 + $0x364] ss:$16 sps:$4 sm:$0xff]   ;;  %v2161_v3 = vld [vmem:[#allocation3 + $0x36c] ss:$16 sps:$4 sm:$0xff]  }
  0x49   :  { %1367 = vmatprep.subr.bf16.mxu0 %v2072_v4  ;;  %1531 = vmatprep.subr.bf16.mxu1 %v2074_v5  ;;  %v2156_v4 = vld [vmem:[#allocation3 + $0x360] ss:$16 sps:$4 sm:$0xff]   ;;  %v2159_v5 = vld [vmem:[#allocation3 + $0x368] ss:$16 sps:$4 sm:$0xff]  }
  0x4c   :  { %1368 = vmatpush1.bf16.msra.mxu0 %v2076_v8  ;;  %1532 = vmatpush1.bf16.msra.mxu1 %v2077_v9  ;;  %v2162_v8 = vld [vmem:[#allocation3 + $0x380] ss:$16 sps:$4 sm:$0xff]   ;;  %v2165_v9 = vld [vmem:[#allocation3 + $0x388] ss:$16 sps:$4 sm:$0xff]  }
  0x4d   :  { %1369 = vmatprep.subr.bf16.mxu0 %v2078_v10  ;;  %1533 = vmatprep.subr.bf16.mxu1 %v2080_v11  ;;  %v2170_v10 = vld [vmem:[#allocation3 + $0x3a4] ss:$16 sps:$4 sm:$0xff]   ;;  %v2173_v11 = vld [vmem:[#allocation3 + $0x3ac] ss:$16 sps:$4 sm:$0xff]  }
  0x50   :  { %1370 = vmatpush1.bf16.msra.mxu0 %v2082_v14  ;;  %1534 = vmatpush1.bf16.msra.mxu1 %v2083_v15  ;;  %v2168_v14 = vld [vmem:[#allocation3 + $0x3a0] ss:$16 sps:$4 sm:$0xff]   ;;  %v2171_v15 = vld [vmem:[#allocation3 + $0x3a8] ss:$16 sps:$4 sm:$0xff]  }
  0x51   :  { %1380 = vmatprep.subr.bf16.mxu0 %v2092_v17  ;;  %1544 = vmatprep.subr.bf16.mxu1 %v2095_v18  ;;  %v2179_v17 = vld [vmem:[#allocation3 + $0x3cc] ss:$16 sps:$4 sm:$0xff]   ;;  %v2174_v18 = vld [vmem:[#allocation3 + $0x3c0] ss:$16 sps:$4 sm:$0xff]  }
  0x53   :  { %1372 = vmatmul.mubr.bf16.vlgmr.msra.gmra.mrb[0].mxu0 %v130_v22  ;;  %1536 = vmatmul.mubr.bf16.vlgmr.msra.gmra.mrb[0].mxu1 %v130_v22  ;;  %v2180_v22 = vld [vmem:[#allocation3 + $0x3e0] ss:$16 sps:$4 sm:$0xff]  }
  0x54   :  { %1381 = vmatpush1.bf16.msra.mxu0 %v2090_v20  ;;  %1545 = vmatpush1.bf16.msra.mxu1 %v2093_v21  ;;  %v2182_v20 = vld [vmem:[#allocation3 + $0x3e4] ss:$16 sps:$4 sm:$0xff]   ;;  %v2185_v21 = vld [vmem:[#allocation3 + $0x3ec] ss:$16 sps:$4 sm:$0xff]  }
  0x55   :  { %1382 = vmatprep.subr.bf16.mxu0 %v2098_v23  ;;  %1546 = vmatprep.subr.bf16.mxu1 %v2101_v24  ;;  %v2183_v23 = vld [vmem:[#allocation3 + $0x3e8] ss:$16 sps:$4 sm:$0xff]   ;;  %v86_v24 = vcombine.low %v2389_v12, %v2392_v13  ;;  %v2200_v12 = vld [vmem:[#allocation3 + $0x444] ss:$16 sps:$4 sm:$0xff]  }
  0x56   :  { %1412 = vmatprep.mubr.bf16.mxu0 %v133_v25  ;;  %1576 = vmatprep.mubr.bf16.mxu1 %v133_v25  ;;  %v2188_v25 = vld [vmem:[#allocation3 + $0x404] ss:$16 sps:$4 sm:$0xff]  }
  0x57   :  { %v2282_v13 = vld [vmem:[%s2438_s0 + $0x8] ss:$14 sps:$4 sm:$0xff]  }
  0x58   :  { %1383 = vmatpush1.bf16.msra.mxu0 %v2096_v26  ;;  %1547 = vmatpush1.bf16.msra.mxu1 %v2099_v27  ;;  %v2191_v26 = vld [vmem:[#allocation3 + $0x40c] ss:$16 sps:$4 sm:$0xff]   ;;  %v2186_v27 = vld [vmem:[#allocation3 + $0x400] ss:$16 sps:$4 sm:$0xff]  }
  0x59   :  { %1384 = vmatprep.subr.bf16.mxu0 %v2104_v28  ;;  %1548 = vmatprep.subr.bf16.mxu1 %v2107_v29  ;;  %v2189_v28 = vld [vmem:[#allocation3 + $0x408] ss:$16 sps:$4 sm:$0xff]   ;;  %v132_v29 = vpack.c.bf16 %v86_v24, %v86_v24  ;;  %v2264_v24 = vld [vmem:[#allocation3 + $0x5a0] ss:$16 sps:$4 sm:$0xff]  }
  0x5c   :  { %1385 = vmatpush1.bf16.msra.mxu0 %v2102_v30  ;;  %1549 = vmatpush1.bf16.msra.mxu1 %v2105_v31  ;;  %v2194_v30 = vld [vmem:[#allocation3 + $0x424] ss:$16 sps:$4 sm:$0xff]   ;;  %v2197_v31 = vld [vmem:[#allocation3 + $0x42c] ss:$16 sps:$4 sm:$0xff]  }
  0x5d   :  { %1386 = vmatprep.subr.bf16.mxu0 %v2110_v32  ;;  %1550 = vmatprep.subr.bf16.mxu1 %v2113_v33  ;;  %v2192_v32 = vld [vmem:[#allocation3 + $0x420] ss:$16 sps:$4 sm:$0xff]   ;;  %v2195_v33 = vld [vmem:[#allocation3 + $0x428] ss:$16 sps:$4 sm:$0xff]  }
  0x60   :  { %1387 = vmatpush1.bf16.msra.mxu0 %v2108_v34  ;;  %1551 = vmatpush1.bf16.msra.mxu1 %v2111_v35  ;;  %v2203_v34 = vld [vmem:[#allocation3 + $0x44c] ss:$16 sps:$4 sm:$0xff]   ;;  %v2285_v35 = vld [vmem:[%s2438_s0 + $0x24] ss:$14 sps:$4 sm:$0xff]  }
  0x61   :  { %1388 = vmatprep.subr.bf16.mxu0 %v2116_v36  ;;  %1552 = vmatprep.subr.bf16.mxu1 %v2119_v37  ;;  %v2405_v36 = vrot.slane %v2282_v13, %v2372_v53  ;;  %v2408_v37 = vrot.slane %v2285_v35, %v2372_v53  ;;  %v2290_v13 = vld [vmem:[#allocation3 + $0x604] ss:$16 sps:$4 sm:$0xff]   ;;  %v2284_v35 = vld [vmem:[%s2438_s0 + $0xc] ss:$14 sps:$4 sm:$0x33]  }
  0x64   :  { %1389 = vmatpush1.bf16.msra.mxu0 %v2114_v38  ;;  %1553 = vmatpush1.bf16.msra.mxu1 %v2117_v39  ;;  %v2198_v38 = vld [vmem:[#allocation3 + $0x440] ss:$16 sps:$4 sm:$0xff]   ;;  %v2201_v39 = vld [vmem:[#allocation3 + $0x448] ss:$16 sps:$4 sm:$0xff]  }
  0x65   :  { %1390 = vmatprep.subr.bf16.mxu0 %v2122_v40  ;;  %1554 = vmatprep.subr.bf16.mxu1 %v2125_v41  ;;  %v2206_v40 = vld [vmem:[#allocation3 + $0x464] ss:$16 sps:$4 sm:$0xff]   ;;  %v2209_v41 = vld [vmem:[#allocation3 + $0x46c] ss:$16 sps:$4 sm:$0xff]  }
  0x68   :  { %1391 = vmatpush1.bf16.msra.mxu0 %v2120_v42  ;;  %1555 = vmatpush1.bf16.msra.mxu1 %v2123_v43  ;;  %v121_v42 = vcombine.high %v2405_v36, %v2408_v37 }
  0x69   :  { %1392 = vmatprep.subr.bf16.mxu0 %v2128_v44  ;;  %1556 = vmatprep.subr.bf16.mxu1 %v2131_v45  ;;  %v2204_v44 = vld [vmem:[#allocation3 + $0x460] ss:$16 sps:$4 sm:$0xff]   ;;  %v2207_v45 = vld [vmem:[#allocation3 + $0x468] ss:$16 sps:$4 sm:$0xff]  }
  0x6a   :  { %v135_v43 = vpack.c.bf16 %v121_v42, %v121_v42  ;;  %v2326_v42 = vmov 0  }
  0x6c   :  { %1393 = vmatpush1.bf16.msra.mxu0 %v2126_v47  ;;  %1557 = vmatpush1.bf16.msra.mxu1 %v2129_v48  ;;  %v2212_v47 = vld [vmem:[#allocation3 + $0x484] ss:$16 sps:$4 sm:$0xff]   ;;  %v2215_v48 = vld [vmem:[#allocation3 + $0x48c] ss:$16 sps:$4 sm:$0xff]  }
  0x6d   :  { %1394 = vmatprep.subr.bf16.mxu0 %v2134_v49  ;;  %1558 = vmatprep.subr.bf16.mxu1 %v2137_v50  ;;  %v2210_v49 = vld [vmem:[#allocation3 + $0x480] ss:$16 sps:$4 sm:$0xff]   ;;  %v2213_v50 = vld [vmem:[#allocation3 + $0x488] ss:$16 sps:$4 sm:$0xff]  }
  0x70   :  { %1395 = vmatpush1.bf16.msra.mxu0 %v2132_v51  ;;  %1559 = vmatpush1.bf16.msra.mxu1 %v2135_v52  ;;  %v2218_v51 = vld [vmem:[#allocation3 + $0x4a4] ss:$16 sps:$4 sm:$0xff]   ;;  %v2221_v52 = vld [vmem:[#allocation3 + $0x4ac] ss:$16 sps:$4 sm:$0xff]  }
  0x71   :  { %1396 = vmatprep.subr.bf16.mxu0 %v2140_v54  ;;  %1560 = vmatprep.subr.bf16.mxu1 %v2143_v55  ;;  %v2216_v54 = vld [vmem:[#allocation3 + $0x4a0] ss:$16 sps:$4 sm:$0xff]   ;;  %v2219_v55 = vld [vmem:[#allocation3 + $0x4a8] ss:$16 sps:$4 sm:$0xff]  }
  0x74   :  { %1397 = vmatpush1.bf16.msra.mxu0 %v2138_v56  ;;  %1561 = vmatpush1.bf16.msra.mxu1 %v2141_v57  ;;  %v2224_v56 = vld [vmem:[#allocation3 + $0x4c4] ss:$16 sps:$4 sm:$0xff]   ;;  %v2227_v57 = vld [vmem:[#allocation3 + $0x4cc] ss:$16 sps:$4 sm:$0xff]  }
  0x75   :  { %1398 = vmatprep.subr.bf16.mxu0 %v2146_v58  ;;  %1562 = vmatprep.subr.bf16.mxu1 %v2149_v59  ;;  %v2222_v58 = vld [vmem:[#allocation3 + $0x4c0] ss:$16 sps:$4 sm:$0xff]   ;;  %v2225_v59 = vld [vmem:[#allocation3 + $0x4c8] ss:$16 sps:$4 sm:$0xff]  }
  0x78   :  { %1399 = vmatpush1.bf16.msra.mxu0 %v2144_v60  ;;  %1563 = vmatpush1.bf16.msra.mxu1 %v2147_v61  ;;  %v2230_v60 = vld [vmem:[#allocation3 + $0x4e4] ss:$16 sps:$4 sm:$0xff]   ;;  %v2233_v61 = vld [vmem:[#allocation3 + $0x4ec] ss:$16 sps:$4 sm:$0xff]  }
  0x79   :  { %1400 = vmatprep.subr.bf16.mxu0 %v2152_v62  ;;  %1564 = vmatprep.subr.bf16.mxu1 %v2155_v63  ;;  %v2228_v62 = vld [vmem:[#allocation3 + $0x4e0] ss:$16 sps:$4 sm:$0xff]   ;;  %v2231_v63 = vld [vmem:[#allocation3 + $0x4e8] ss:$16 sps:$4 sm:$0xff]  }
  0x7c   :  { %1401 = vmatpush1.bf16.msra.mxu0 %v2150_v0  ;;  %1565 = vmatpush1.bf16.msra.mxu1 %v2153_v1  ;;  %v2236_v0 = vld [vmem:[#allocation3 + $0x504] ss:$16 sps:$4 sm:$0xff]   ;;  %v2239_v1 = vld [vmem:[#allocation3 + $0x50c] ss:$16 sps:$4 sm:$0xff]  }
  0x7d   :  { %1402 = vmatprep.subr.bf16.mxu0 %v2158_v2  ;;  %1566 = vmatprep.subr.bf16.mxu1 %v2161_v3  ;;  %v2234_v2 = vld [vmem:[#allocation3 + $0x500] ss:$16 sps:$4 sm:$0xff]   ;;  %v2237_v3 = vld [vmem:[#allocation3 + $0x508] ss:$16 sps:$4 sm:$0xff]  }
  0x80   :  { %1403 = vmatpush1.bf16.msra.mxu0 %v2156_v4  ;;  %1567 = vmatpush1.bf16.msra.mxu1 %v2159_v5  ;;  %v2242_v4 = vld [vmem:[#allocation3 + $0x524] ss:$16 sps:$4 sm:$0xff]   ;;  %v2245_v5 = vld [vmem:[#allocation3 + $0x52c] ss:$16 sps:$4 sm:$0xff]  }
  0x81   :  { %1404 = vmatprep.subr.bf16.mxu0 %v2164_v6  ;;  %1568 = vmatprep.subr.bf16.mxu1 %v2167_v7  ;;  %v2240_v6 = vld [vmem:[#allocation3 + $0x520] ss:$16 sps:$4 sm:$0xff]   ;;  %v2243_v7 = vld [vmem:[#allocation3 + $0x528] ss:$16 sps:$4 sm:$0xff]  }
  0x84   :  { %1405 = vmatpush1.bf16.msra.mxu0 %v2162_v8  ;;  %1569 = vmatpush1.bf16.msra.mxu1 %v2165_v9  ;;  %v2248_v8 = vld [vmem:[#allocation3 + $0x544] ss:$16 sps:$4 sm:$0xff]   ;;  %v2251_v9 = vld [vmem:[#allocation3 + $0x54c] ss:$16 sps:$4 sm:$0xff]  }
  0x85   :  { %1406 = vmatprep.subr.bf16.mxu0 %v2170_v10  ;;  %1570 = vmatprep.subr.bf16.mxu1 %v2173_v11  ;;  %v2246_v10 = vld [vmem:[#allocation3 + $0x540] ss:$16 sps:$4 sm:$0xff]   ;;  %v2249_v11 = vld [vmem:[#allocation3 + $0x548] ss:$16 sps:$4 sm:$0xff]  }
  0x88   :  { %1407 = vmatpush1.bf16.msra.mxu0 %v2168_v14  ;;  %1571 = vmatpush1.bf16.msra.mxu1 %v2171_v15  ;;  %v2254_v14 = vld [vmem:[#allocation3 + $0x564] ss:$16 sps:$4 sm:$0xff]   ;;  %v2257_v15 = vld [vmem:[#allocation3 + $0x56c] ss:$16 sps:$4 sm:$0xff]  }
  0x89   :  { %1408 = vmatprep.subr.bf16.mxu0 %v2176_v16  ;;  %1572 = vmatprep.subr.bf16.mxu1 %v2179_v17  ;;  %v2252_v16 = vld [vmem:[#allocation3 + $0x560] ss:$16 sps:$4 sm:$0xff]   ;;  %v2255_v17 = vld [vmem:[#allocation3 + $0x568] ss:$16 sps:$4 sm:$0xff]  }
  0x8c   :  { %1409 = vmatpush1.bf16.msra.mxu0 %v2174_v18  ;;  %1573 = vmatpush1.bf16.msra.mxu1 %v2177_v19  ;;  %v2260_v18 = vld [vmem:[#allocation3 + $0x584] ss:$16 sps:$4 sm:$0xff]   ;;  %v2263_v19 = vld [vmem:[#allocation3 + $0x58c] ss:$16 sps:$4 sm:$0xff]  }
  0x8d   :  { %1410 = vmatprep.subr.bf16.mxu0 %v2182_v20  ;;  %1574 = vmatprep.subr.bf16.mxu1 %v2185_v21  ;;  %v2258_v20 = vld [vmem:[#allocation3 + $0x580] ss:$16 sps:$4 sm:$0xff]   ;;  %v2261_v21 = vld [vmem:[#allocation3 + $0x588] ss:$16 sps:$4 sm:$0xff]  }
  0x90   :  { %1411 = vmatpush1.bf16.msra.mxu0 %v2180_v22  ;;  %1575 = vmatpush1.bf16.msra.mxu1 %v2183_v23  ;;  %v2266_v22 = vld [vmem:[#allocation3 + $0x5a4] ss:$16 sps:$4 sm:$0xff]   ;;  %v2269_v23 = vld [vmem:[#allocation3 + $0x5ac] ss:$16 sps:$4 sm:$0xff]  }
  0x91   :  { %1421 = vmatprep.subr.bf16.mxu0 %v2188_v25  ;;  %1585 = vmatprep.subr.bf16.mxu1 %v2191_v26  ;;  %v2267_v25 = vld [vmem:[#allocation3 + $0x5a8] ss:$16 sps:$4 sm:$0xff]   ;;  %v2272_v26 = vld [vmem:[#allocation3 + $0x5c4] ss:$16 sps:$4 sm:$0xff]  }
  0x93   :  { %1413 = vmatmul.mubr.bf16.vlgmr.msra.gmra.mrb[0].mxu0 %v132_v29  ;;  %1577 = vmatmul.mubr.bf16.vlgmr.msra.gmra.mrb[0].mxu1 %v132_v29  ;;  %v2273_v29 = vld [vmem:[#allocation3 + $0x5c8] ss:$16 sps:$4 sm:$0xff]  }
  0x94   :  { %1422 = vmatpush1.bf16.msra.mxu0 %v2186_v27  ;;  %1586 = vmatpush1.bf16.msra.mxu1 %v2189_v28  ;;  %v2275_v27 = vld [vmem:[#allocation3 + $0x5cc] ss:$16 sps:$4 sm:$0xff]   ;;  %v2270_v28 = vld [vmem:[#allocation3 + $0x5c0] ss:$16 sps:$4 sm:$0xff]  }
  0x95   :  { %1423 = vmatprep.subr.bf16.mxu0 %v2194_v30  ;;  %1587 = vmatprep.subr.bf16.mxu1 %v2197_v31  ;;  %v2278_v30 = vld [vmem:[#allocation3 + $0x5e4] ss:$16 sps:$4 sm:$0xff]   ;;  %v2281_v31 = vld [vmem:[#allocation3 + $0x5ec] ss:$16 sps:$4 sm:$0xff]  }
  0x96   :  { %1453 = vmatprep.mubr.bf16.mxu0 %v135_v43  ;;  %1617 = vmatprep.mubr.bf16.mxu1 %v135_v43 }
  0x98   :  { %1424 = vmatpush1.bf16.msra.mxu0 %v2192_v32  ;;  %1588 = vmatpush1.bf16.msra.mxu1 %v2195_v33  ;;  %v120_v32 = vcombine.low %v2405_v36, %v2408_v37  ;;  %v2276_v33 = vld [vmem:[#allocation3 + $0x5e0] ss:$16 sps:$4 sm:$0xff]   ;;  %v2291_v37 = vld [vmem:[#allocation3 + $0x608] ss:$16 sps:$4 sm:$0xff]  }
  0x99   :  { %1425 = vmatprep.subr.bf16.mxu0 %v2200_v12  ;;  %1589 = vmatprep.subr.bf16.mxu1 %v2203_v34  ;;  %v2279_v12 = vld [vmem:[#allocation3 + $0x5e8] ss:$16 sps:$4 sm:$0xff]   ;;  %v2293_v34 = vld [vmem:[#allocation3 + $0x60c] ss:$16 sps:$4 sm:$0xff]   ;;  %v2288_v36 = vld [vmem:[#allocation3 + $0x600] ss:$16 sps:$4 sm:$0xff]  }
  0x9c   :  { %1426 = vmatpush1.bf16.msra.mxu0 %v2198_v38  ;;  %1590 = vmatpush1.bf16.msra.mxu1 %v2201_v39  ;;  %v2287_v38 = vld [vmem:[%s2438_s0 + $0x28] ss:$14 sps:$4 sm:$0x33]   ;;  %v134_v39 = vpack.c.bf16 %v120_v32, %v120_v32 }
  0x9d   :  { %1427 = vmatprep.subr.bf16.mxu0 %v2206_v40  ;;  %1591 = vmatprep.subr.bf16.mxu1 %v2209_v41  ;;  %v105_v40 = vrot.slane %v2284_v35, %v2372_v53  ;;  %v119_v41 = vrot.slane %v2287_v38, %v2372_v53  ;;  %v333_v53 = vld [vmem:[%s2440_s2] sm:$0xf] }
  0x9f   :  { %v122_v43 = vcombine.low %v105_v40, %v119_v41 }
  0xa0   :  { %1428 = vmatpush1.bf16.msra.mxu0 %v2204_v44  ;;  %1592 = vmatpush1.bf16.msra.mxu1 %v2207_v45  ;;  %v337_v45 = vsub.s32 0, %v2369_v46 }
  0xa1   :  { %1429 = vmatprep.subr.bf16.mxu0 %v2212_v47  ;;  %1593 = vmatprep.subr.bf16.mxu1 %v2215_v48  ;;  %v136_v44 = vpack.c.bf16 %v122_v43, %v122_v43  ;;  %v345_v47 = vsub.s32 2, %v2369_v46  ;;  %v341_v48 = vsub.s32 1, %v2369_v46 }
  0xa4   :  { %1430 = vmatpush1.bf16.msra.mxu0 %v2210_v49  ;;  %1594 = vmatpush1.bf16.msra.mxu1 %v2213_v50  ;;  %v349_v49 = vsub.s32 3, %v2369_v46  ;;  %v338_v50 = vrot.slane %v333_v53, %v337_v45 }
  0xa5   :  { %1431 = vmatprep.subr.bf16.mxu0 %v2218_v51  ;;  %1595 = vmatprep.subr.bf16.mxu1 %v2221_v52  ;;  %v346_v51 = vrot.slane %v333_v53, %v345_v47  ;;  %v342_v52 = vrot.slane %v333_v53, %v341_v48 }
  0xa8   :  { %1432 = vmatpush1.bf16.msra.mxu0 %v2216_v54  ;;  %1596 = vmatpush1.bf16.msra.mxu1 %v2219_v55  ;;  %v350_v54 = vrot.slane %v333_v53, %v349_v49 }
  0xa9   :  { %1433 = vmatprep.subr.bf16.mxu0 %v2224_v56  ;;  %1597 = vmatprep.subr.bf16.mxu1 %v2227_v57  ;;  %v1675_v56 = vld [vmem:[%s2441_s3] sm:$0xf] }
  0xaa   :  { %v1680_v46 = vrot.slane %v1675_v56, %v337_v45 }
  0xac   :  { %1434 = vmatpush1.bf16.msra.mxu0 %v2222_v58  ;;  %1598 = vmatpush1.bf16.msra.mxu1 %v2225_v59 }
  0xad   :  { %1435 = vmatprep.subr.bf16.mxu0 %v2230_v60  ;;  %1599 = vmatprep.subr.bf16.mxu1 %v2233_v61 }
  0xb0   :  { %1436 = vmatpush1.bf16.msra.mxu0 %v2228_v62  ;;  %1600 = vmatpush1.bf16.msra.mxu1 %v2231_v63 }
  0xb1   :  { %1437 = vmatprep.subr.bf16.mxu0 %v2236_v0  ;;  %1601 = vmatprep.subr.bf16.mxu1 %v2239_v1 }
  0xb4   :  { %1438 = vmatpush1.bf16.msra.mxu0 %v2234_v2  ;;  %1602 = vmatpush1.bf16.msra.mxu1 %v2237_v3 }
  0xb5   :  { %1439 = vmatprep.subr.bf16.mxu0 %v2242_v4  ;;  %1603 = vmatprep.subr.bf16.mxu1 %v2245_v5 }
  0xb8   :  { %1440 = vmatpush1.bf16.msra.mxu0 %v2240_v6  ;;  %1604 = vmatpush1.bf16.msra.mxu1 %v2243_v7  ;;  %v1684_v7 = vrot.slane %v1675_v56, %v341_v48 }
  0xb9   :  { %1441 = vmatprep.subr.bf16.mxu0 %v2248_v8  ;;  %1605 = vmatprep.subr.bf16.mxu1 %v2251_v9 }
  0xbc   :  { %1442 = vmatpush1.bf16.msra.mxu0 %v2246_v10  ;;  %1606 = vmatpush1.bf16.msra.mxu1 %v2249_v11 }
  0xbd   :  { %1443 = vmatprep.subr.bf16.mxu0 %v2254_v14  ;;  %1607 = vmatprep.subr.bf16.mxu1 %v2257_v15  ;;  %v1688_v14 = vrot.slane %v1675_v56, %v345_v47 }
  0xc0   :  { %1444 = vmatpush1.bf16.msra.mxu0 %v2252_v16  ;;  %1608 = vmatpush1.bf16.msra.mxu1 %v2255_v17 }
  0xc1   :  { %1445 = vmatprep.subr.bf16.mxu0 %v2260_v18  ;;  %1609 = vmatprep.subr.bf16.mxu1 %v2263_v19  ;;  %v1692_v18 = vrot.slane %v1675_v56, %v349_v49 }
  0xc4   :  { %1446 = vmatpush1.bf16.msra.mxu0 %v2258_v20  ;;  %1610 = vmatpush1.bf16.msra.mxu1 %v2261_v21 }
  0xc5   :  { %1447 = vmatprep.subr.bf16.mxu0 %v2266_v22  ;;  %1611 = vmatprep.subr.bf16.mxu1 %v2269_v23 }
  0xc8   :  { %1448 = vmatpush1.bf16.msra.mxu0 %v2264_v24  ;;  %1612 = vmatpush1.bf16.msra.mxu1 %v2267_v25  ;;  %v1707_v24 = vstv %s2442_s4 }
  0xc9   :  { %1449 = vmatprep.subr.bf16.mxu0 %v2272_v26  ;;  %1613 = vmatprep.subr.bf16.mxu1 %v2275_v27 }
  0xcc   :  { %1450 = vmatpush1.bf16.msra.mxu0 %v2270_v28  ;;  %1614 = vmatpush1.bf16.msra.mxu1 %v2273_v29 }
  0xcd   :  { %1451 = vmatprep.subr.bf16.mxu0 %v2278_v30  ;;  %1615 = vmatprep.subr.bf16.mxu1 %v2281_v31 }
  0xd0   :  { %1452 = vmatpush1.bf16.msra.mxu0 %v2276_v33  ;;  %1616 = vmatpush1.bf16.msra.mxu1 %v2279_v12 }
  0xd1   :  { %1462 = vmatprep.subr.bf16.mxu0 %v2290_v13  ;;  %1626 = vmatprep.subr.bf16.mxu1 %v2293_v34 }
  0xd3   :  { %1454 = vmatmul.mubr.bf16.vlgmr.msra.gmra.mrb[0].mxu0 %v134_v39  ;;  %1618 = vmatmul.mubr.bf16.vlgmr.msra.gmra.mrb[0].mxu1 %v134_v39 }
  0xd4   :  { %1463 = vmatpush1.bf16.msra.mxu0 %v2288_v36  ;;  %1627 = vmatpush1.bf16.msra.mxu1 %v2291_v37 }
  0xd5   :  { %1494 = vmatprep.mubr.bf16.mxu0 %v2326_v42  ;;  %1658 = vmatprep.mubr.bf16.mxu1 %v2326_v42 }
  0xdf   :  { %1953 = vmatmul.mubr.msk.bf16.vlgmr.msra.gmra.mrb[0].mxu0 %vm1335_vm0, %v136_v44  ;;  %1954 = vmatmul.mubr.msk.bf16.vlgmr.msra.gmra.mrb[0].mxu1 %vm1335_vm0, %v136_v44 }
 0x1b2   :  { %v1496_v55 = vpop.f32.mrb[0].mxu0  ;;  %v1660_v57 = vpop.f32.mrb[0].mxu1 }
 0x1b3   :  { %v1955_v58 = vadd.f32 %v1496_v55, %v338_v50  ;;  %v1957_v59 = vadd.f32 %v1660_v57, %v346_v51  ;;  %v1498_v60 = vpop.f32.mrb[1].mxu0  ;;  %v1662_v61 = vpop.f32.mrb[1].mxu1 }
 0x1b4   :  { %v1956_v62 = vadd.f32 %v1498_v60, %v342_v52  ;;  %v1958_v63 = vadd.f32 %v1662_v61, %v350_v54  ;;  %v1500_v0 = vpop.f32.mrb[2].mxu0  ;;  %v1664_v1 = vpop.f32.mrb[2].mxu1 }
 0x1b5   :  { %v1667_v2 = vmul.f32 0.2, %v1955_v58  ;;  %v1669_v3 = vmul.f32 0.2, %v1957_v59  ;;  %v1501_v4 = vpop.f32.mrb[3].mxu0  ;;  %v1665_v5 = vpop.f32.mrb[3].mxu1 }
 0x1b6   :  { %v1668_v6 = vmul.f32 0.2, %v1956_v62  ;;  %v1670_v8 = vmul.f32 0.2, %v1958_v63 }
 0x1b7   :  { %v1671_v9 = vmax.f32 %v1955_v58, %v1667_v2  ;;  %v1673_v10 = vmax.f32 %v1957_v59, %v1669_v3 }
 0x1b8   :  { %v1672_v11 = vmax.f32 %v1956_v62, %v1668_v6  ;;  %v1674_v17 = vmax.f32 %v1958_v63, %v1670_v8 }
 0x1b9   :  { %v1697_v15 = vmul.f32 %v1680_v46, %v1671_v9  ;;  %v1699_v19 = vmul.f32 %v1688_v14, %v1673_v10 }
 0x1ba   :  { %v1698_v16 = vmul.f32 %v1684_v7, %v1672_v11  ;;  %v1700_v21 = vmul.f32 %v1692_v18, %v1674_v17 }
 0x1bc   :  { %v1701_v20 = vadd.f32 %v1698_v16, %v1697_v15 }
 0x1be   :  { %v1702_v22 = vadd.f32 %v1701_v20, %v1699_v19 }
 0x1c0   :  { %v1703_v23 = vadd.f32 %v1702_v22, %v1700_v21 }
 0x1c2   :  { %1704 = vadd.xlane.f32.xlu0 %v1703_v23 }
 0x24f   :  { %v1705_v25 = vpop.xlane.xlu0 %1704 }
 0x250   :  { %v1708_v26 = vadd.f32 %v1707_v24, %v1705_v25 }
 0x252   :  { %v1709_v27 = vsub.f32 0.0, %v1708_v26 }
 0x254   :  { %v1710_v28 = vmul.f32 1.442695, %v1709_v27 }
 0x256   :  { %2294 = vpow2.f32 %v1710_v28 }
 0x260   :  { %v2295_v29 = vpop.eup %2294 }
 0x261   :  { %v1712_v30 = vadd.f32 1.0, %v2295_v29 }
 0x263   :  { %2296 = vrcp.f32 %v1712_v30 }
 0x26d   :  { %v2297_v31 = vpop.eup %2296 }
 0x26e   :  { %1716 = vst.msk [vmem:[#allocation5] sm:$0xff] %vm1715_vm1, %v2297_v31 }
 0x275   :  { %v1734_v32 = vld [vmem:[#allocation5] sm:$0x3] }
 0x276   :  { %1735 = vst [vmem:[%s2443_s5] sm:$0x3] %v1734_v32 }
 0x277   :  { %1752 = vsyncpa [#allocation4], 1 }

</bundles_post_ra>
